<compile_context>
chip_gen: v7x
topology: tpu7x:2x2x1
jax: 0.10.0
libtpu: 0.0.40
codegen_flags: <defaults>
</compile_context>

<pallas_src>
import jax
import jax.numpy as jnp
from jax.experimental import pallas as pl
from jax.experimental.pallas import tpu as pltpu


# ---------------------------------------------------------------------------
# Shared fused GRU step (operates on in-VMEM values / weight refs)
# ---------------------------------------------------------------------------
def _gru_step(x, h, w0x_ref, w0h_ref, b0_ref, wl_ref, bl_ref,
              wout_ref, bout_ref, n_layer):
    """One fused GRU-cell step.

    x: [B, Din] f32, h: [B, Dh] f32.
    Fused intermediate feature order: [x_r | x_z | x_n | h_r | h_z | h_n]  (width F).
    Output projection is r/z-folded: y = [g_r_sum | g_z_sum | g_in | g_hn] (width 4*Dh).
    """
    Dh = h.shape[-1]
    cd = w0x_ref.dtype  # compute dtype of the fused weights (bf16)

    # Layer 0: two MXU pushes (x- and h-input halves), summed in f32.
    v = (jnp.dot(x.astype(cd), w0x_ref[...], preferred_element_type=jnp.float32)
         + jnp.dot(h.astype(cd), w0h_ref[...], preferred_element_type=jnp.float32))
    v = jnp.maximum(v + b0_ref[...], 0.0)

    # Hidden layers 1..n_layer-1: block-diagonal fused weights, one matmul each.
    for l in range(n_layer - 1):
        v = jnp.dot(v.astype(cd), wl_ref[l], preferred_element_type=jnp.float32)
        v = jnp.maximum(v + bl_ref[l], 0.0)

    # Output projection for all 6 branches in one matmul; r/z pair-sums folded into wout.
    # (funcsgru dropout has p=0 == identity.)
    y = jnp.dot(v.astype(cd), wout_ref[...],
                preferred_element_type=jnp.float32) + bout_ref[...]

    r_t = jax.nn.sigmoid(y[:, 0 * Dh:1 * Dh])          # g_ir + g_hr
    z_t = jax.nn.sigmoid(y[:, 1 * Dh:2 * Dh])          # g_iz + g_hz
    n_t = jnp.tanh(y[:, 2 * Dh:3 * Dh] + y[:, 3 * Dh:4 * Dh] * r_t)
    return (1.0 - z_t) * n_t + z_t * h


# ---------------------------------------------------------------------------
# Kernels
# ---------------------------------------------------------------------------
def _make_cell_kernel(n_layer):
    """Single-step cell kernel: (x, h) -> h_t."""
    def kernel(x_ref, h_ref, w0x_ref, w0h_ref, b0_ref, *rest):
        if n_layer > 1:
            wl_ref, bl_ref, wout_ref, bout_ref, out_ref = rest
        else:
            wl_ref = bl_ref = None
            wout_ref, bout_ref, out_ref = rest
        h = h_ref[...].astype(jnp.float32)
        h_t = _gru_step(x_ref[...], h, w0x_ref, w0h_ref, b0_ref,
                        wl_ref, bl_ref, wout_ref, bout_ref, n_layer)
        out_ref[...] = h_t.astype(out_ref.dtype)
    return kernel


def _make_seq_kernel(n_layer):
    """Sequence kernel: grid=(T,), weights VMEM-resident, h carried in VMEM scratch."""
    def kernel(x_ref, h0_ref, w0x_ref, w0h_ref, b0_ref, *rest):
        if n_layer > 1:
            wl_ref, bl_ref, wout_ref, bout_ref, out_ref, h_scratch = rest
        else:
            wl_ref = bl_ref = None
            wout_ref, bout_ref, out_ref, h_scratch = rest

        t = pl.program_id(0)

        @pl.when(t == 0)
        def _():
            h_scratch[...] = h0_ref[...].astype(jnp.float32)

        h = h_scratch[...]
        h_t = _gru_step(x_ref[0], h, w0x_ref, w0h_ref, b0_ref,
                        wl_ref, bl_ref, wout_ref, bout_ref, n_layer)
        h_scratch[...] = h_t
        # TODO(synk): for very long T, accumulate a lane-dense [T_chunk, B*Dh] slab in VMEM
        # scratch and store per chunk instead of per-step 32-lane masked stores.
        out_ref[0] = h_t.astype(out_ref.dtype)
    return kernel


# ---------------------------------------------------------------------------
# Wrappers
# ---------------------------------------------------------------------------
def _resident_spec(arr):
    """Whole array, same block for every grid step -> stays VMEM-resident."""
    nd = arr.ndim
    return pl.BlockSpec(arr.shape, lambda *_, _n=nd: (0,) * _n)


def _weight_operands_and_specs(fused, n_layer):
    ops = [fused["w0x"], fused["w0h"], fused["b0"]]
    if n_layer > 1:
        ops += [fused["wl"], fused["bl"]]
    ops += [fused["wout"], fused["bout"]]
    return ops, [_resident_spec(a) for a in ops]


def _step_cost(B, Din, Dh, F, n_layer):
    flops = 2 * B * (Din + Dh) * F                  # layer 0 (two halves)
    flops += (n_layer - 1) * 2 * B * F * F          # hidden layers
    flops += 2 * B * F * (4 * Dh)                   # folded output projection
    transcendentals = 3 * B * Dh                    # 2 sigmoids + 1 tanh
    return flops, transcendentals


def mygru_forward(x, h, fused, n_layer, *, batch_block=None):
    """Single GRU-cell step. x: [B, Din], h: [B, Dh] -> h_t: [B, Dh]."""
    B, Din = x.shape
    Dh = h.shape[-1]
    F = fused["w0x"].shape[-1]

    bb = B if batch_block is None else batch_block
    assert B % bb == 0 and (bb == B or bb % 8 == 0), \
        "batch block must be 8-aligned or the full batch"
    grid = (pl.cdiv(B, bb),)

    w_ops, w_specs = _weight_operands_and_specs(fused, n_layer)
    operands = [x, h] + w_ops
    in_specs = [pl.BlockSpec((bb, Din), lambda i: (i, 0)),
                pl.BlockSpec((bb, Dh), lambda i: (i, 0))] + w_specs

    flops, transc = _step_cost(B, Din, Dh, F, n_layer)
    bytes_accessed = sum(int(a.size) * a.dtype.itemsize for a in operands) + B * Dh * 4
    cost = pl.CostEstimate(flops=flops, transcendentals=transc,
                           bytes_accessed=bytes_accessed)

    return pl.pallas_call(
        _make_cell_kernel(n_layer),
        out_shape=jax.ShapeDtypeStruct((B, Dh), jnp.float32),
        grid=grid,
        in_specs=in_specs,
        out_specs=pl.BlockSpec((bb, Dh), lambda i: (i, 0)),
        compiler_params=pltpu.CompilerParams(
            dimension_semantics=("parallel",)),   # v7x shards batch blocks over 2 TCs if >=2
        cost_estimate=cost,
    )(*operands)


def mygru_sequence(x_seq, h0, fused, n_layer):
    """Apply the cell over a sequence inside one kernel.

    x_seq: [T, B, Din], h0: [B, Dh] -> h_seq: [T, B, Dh]  (h_seq[t] is the state after step t).
    Weights are loaded into VMEM once; h is carried in a VMEM scratch across grid steps.
    """
    T, B, Din = x_seq.shape
    Dh = h0.shape[-1]
    F = fused["w0x"].shape[-1]

    w_ops, w_specs = _weight_operands_and_specs(fused, n_layer)
    operands = [x_seq, h0] + w_ops
    in_specs = [pl.BlockSpec((1, B, Din), lambda t: (t, 0, 0)),
                pl.BlockSpec((B, Dh), lambda t: (0, 0))] + w_specs

    flops, transc = _step_cost(B, Din, Dh, F, n_layer)
    bytes_accessed = (sum(int(a.size) * a.dtype.itemsize for a in w_ops)
                      + int(x_seq.size) * 4 + B * Dh * 4 + T * B * Dh * 4)
    cost = pl.CostEstimate(flops=T * flops, transcendentals=T * transc,
                           bytes_accessed=bytes_accessed)

    return pl.pallas_call(
        _make_seq_kernel(n_layer),
        out_shape=jax.ShapeDtypeStruct((T, B, Dh), jnp.float32),
        grid=(T,),
        in_specs=in_specs,
        out_specs=pl.BlockSpec((1, B, Dh), lambda t: (t, 0, 0)),
        scratch_shapes=[pltpu.VMEM((B, Dh), jnp.float32)],   # carried hidden state
        compiler_params=pltpu.CompilerParams(
            dimension_semantics=("arbitrary",)),              # sequential dependence over T
        cost_estimate=cost,
    )(*operands)


# ---------------------------------------------------------------------------
# Parameter construction (per-gate, PyTorch-equivalent layout) + fusion
# ---------------------------------------------------------------------------
def init_params(key, n_layer, input_dim, hidden_dim):
    """Deterministic synthetic parameters, stacked over the 3 gates (r, z, n).
    Linear weights stored pre-transposed as [in, out] so y = x @ W + b."""
    ks = jax.random.split(key, 8)
    s = 0.1
    return {
        "wxl": (jax.random.normal(ks[0], (3, n_layer, input_dim, input_dim)) * s).astype(jnp.float32),
        "bxl": (jax.random.normal(ks[1], (3, n_layer, input_dim)) * s).astype(jnp.float32),
        "wxo": (jax.random.normal(ks[2], (3, input_dim, hidden_dim)) * s).astype(jnp.float32),
        "bxo": (jax.random.normal(ks[3], (3, hidden_dim)) * s).astype(jnp.float32),
        "whl": (jax.random.normal(ks[4], (3, n_layer, hidden_dim, hidden_dim)) * s).astype(jnp.float32),
        "bhl": (jax.random.normal(ks[5], (3, n_layer, hidden_dim)) * s).astype(jnp.float32),
        "who": (jax.random.normal(ks[6], (3, hidden_dim, hidden_dim)) * s).astype(jnp.float32),
        "bho": (jax.random.normal(ks[7], (3, hidden_dim)) * s).astype(jnp.float32),
    }


def fuse_params(params, n_layer, input_dim, hidden_dim, compute_dtype=jnp.bfloat16):
    """Pack the 6 funcsgru branches into fused weights.

    Intermediate feature order: [x_r | x_z | x_n | h_r | h_z | h_n] (width F = 3*(Din+Dh)).
    Output projection is r/z-folded to width 4*Dh: [g_r_sum | g_z_sum | g_in | g_hn].
    Zero off-diagonal blocks are exact, so gates remain independent (no leakage).
    """
    Din, Dh = input_dim, hidden_dim
    F = 3 * (Din + Dh)
    f32 = jnp.float32

    wxl, bxl = params["wxl"], params["bxl"]
    wxo, bxo = params["wxo"], params["bxo"]
    whl, bhl = params["whl"], params["bhl"]
    who, bho = params["who"], params["bho"]

    def cat6_layer(l):
        return jnp.concatenate([bxl[0, l], bxl[1, l], bxl[2, l],
                                bhl[0, l], bhl[1, l], bhl[2, l]], axis=0)

    # Layer 0, split into the x-input and h-input halves: v = x@w0x + h@w0h + b0.
    w0x = jnp.zeros((Din, F), f32)
    w0h = jnp.zeros((Dh, F), f32)
    for g in range(3):
        w0x = w0x.at[:, g * Din:(g + 1) * Din].set(wxl[g, 0])
        w0h = w0h.at[:, 3 * Din + g * Dh:3 * Din + (g + 1) * Dh].set(whl[g, 0])
    b0 = cat6_layer(0)[None, :]

    fused = {"w0x": w0x.astype(compute_dtype), "w0h": w0h.astype(compute_dtype),
             "b0": b0.astype(f32)}

    # Hidden layers 1..n_layer-1: block-diagonal [F, F] (only materialized when needed).
    if n_layer > 1:
        wl = jnp.stack([
            jax.scipy.linalg.block_diag(wxl[0, l], wxl[1, l], wxl[2, l],
                                        whl[0, l], whl[1, l], whl[2, l])
            for l in range(1, n_layer)])
        bl = jnp.stack([cat6_layer(l)[None, :] for l in range(1, n_layer)])
        fused["wl"] = wl.astype(compute_dtype)
        fused["bl"] = bl.astype(f32)

    # Output projection with r/z folding: [F, 4*Dh], lane-dense (4*Dh = 128 at Dh = 32).
    wout = jnp.zeros((F, 4 * Dh), f32)
    wout = wout.at[0:Din, 0:Dh].set(wxo[0])                              # x_r -> r-sum
    wout = wout.at[Din:2 * Din, Dh:2 * Dh].set(wxo[1])                   # x_z -> z-sum
    wout = wout.at[2 * Din:3 * Din, 2 * Dh:3 * Dh].set(wxo[2])           # x_n -> g_in
    o = 3 * Din
    wout = wout.at[o:o + Dh, 0:Dh].set(who[0])                           # h_r -> r-sum
    wout = wout.at[o + Dh:o + 2 * Dh, Dh:2 * Dh].set(who[1])             # h_z -> z-sum
    wout = wout.at[o + 2 * Dh:o + 3 * Dh, 3 * Dh:4 * Dh].set(who[2])     # h_n -> g_hn
    bout = jnp.concatenate([bxo[0] + bho[0], bxo[1] + bho[1], bxo[2], bho[2]],
                           axis=0)[None, :]

    fused["wout"] = wout.astype(compute_dtype)
    fused["bout"] = bout.astype(f32)
    return fused


# ---------------------------------------------------------------------------
# Pure-JAX reference mirroring the PyTorch forward (dropout p=0)
# ---------------------------------------------------------------------------
def mygru_reference(x, h, params, n_layer, matmul_dtype=jnp.float32):
    """matmul_dtype=jnp.bfloat16 mirrors the kernel's precision (bf16 operands, f32 accum)."""
    def funcsgru(v, w_lins, b_lins, w_out, b_out, g):
        for l in range(n_layer):
            v = jax.nn.relu(
                jnp.dot(v.astype(matmul_dtype), w_lins[g, l].astype(matmul_dtype),
                        preferred_element_type=jnp.float32) + b_lins[g, l])
        return jnp.dot(v.astype(matmul_dtype), w_out[g].astype(matmul_dtype),
                       preferred_element_type=jnp.float32) + b_out[g]

    g_ir = funcsgru(x, params["wxl"], params["bxl"], params["wxo"], params["bxo"], 0)
    g_iz = funcsgru(x, params["wxl"], params["bxl"], params["wxo"], params["bxo"], 1)
    g_in = funcsgru(x, params["wxl"], params["bxl"], params["wxo"], params["bxo"], 2)
    g_hr = funcsgru(h, params["whl"], params["bhl"], params["who"], params["bho"], 0)
    g_hz = funcsgru(h, params["whl"], params["bhl"], params["who"], params["bho"], 1)
    g_hn = funcsgru(h, params["whl"], params["bhl"], params["who"], params["bho"], 2)

    r_t = jax.nn.sigmoid(g_ir + g_hr)
    z_t = jax.nn.sigmoid(g_iz + g_hz)
    n_t = jnp.tanh(g_in + g_hn * r_t)
    return (1.0 - z_t) * n_t + z_t * h


if __name__ == "__main__":
    n_layer = 2
    input_dim = 32
    hidden_dim = 32
    batch = 8
    seq_len = 4

    key = jax.random.PRNGKey(0)
    kx, kh, kp, ks = jax.random.split(key, 4)
    x = jax.random.normal(kx, (batch, input_dim), dtype=jnp.float32)
    h = jax.random.normal(kh, (batch, hidden_dim), dtype=jnp.float32)
    params = init_params(kp, n_layer, input_dim, hidden_dim)
    fused = fuse_params(params, n_layer, input_dim, hidden_dim)

    # --- single-step cell (the module's forward) -----------------------------------------
    h_t = jax.block_until_ready(mygru_forward(x, h, fused, n_layer))
    assert h_t.shape == (batch, hidden_dim)

    # Precision-matched check (bf16 matmul operands, f32 accumulation — mirrors the kernel).
    ref_bf16 = mygru_reference(x, h, params, n_layer, matmul_dtype=jnp.bfloat16)
    assert jnp.allclose(h_t, ref_bf16, atol=2e-3, rtol=2e-3), \
        "Pallas kernel mismatch vs precision-matched reference"

    # Full-f32 check (original PyTorch semantics); tolerance accounts for bf16 operands.
    ref_f32 = mygru_reference(x, h, params, n_layer, matmul_dtype=jnp.float32)
    assert jnp.allclose(h_t, ref_f32, atol=5e-2, rtol=5e-2), \
        "Pallas kernel mismatch vs f32 reference"

    # --- n_layer == 1 path (no dummy hidden-layer weights are DMA'd) ---------------------
    params1 = init_params(kp, 1, input_dim, hidden_dim)
    fused1 = fuse_params(params1, 1, input_dim, hidden_dim)
    h1 = jax.block_until_ready(mygru_forward(x, h, fused1, 1))
    ref1 = mygru_reference(x, h, params1, 1, matmul_dtype=jnp.float32)
    assert jnp.allclose(h1, ref1, atol=5e-2, rtol=5e-2), "n_layer=1 kernel mismatch"

    # --- sequence variant: T steps inside one pallas_call --------------------------------
    x_seq = jax.random.normal(ks, (seq_len, batch, input_dim), dtype=jnp.float32)
    h_seq = jax.block_until_ready(mygru_sequence(x_seq, h, fused, n_layer))
    assert h_seq.shape == (seq_len, batch, hidden_dim)

    # Must match iterating the single-step kernel (identical fused weights / dtypes).
    hc = h
    outs = []
    for t in range(seq_len):
        hc = mygru_forward(x_seq[t], hc, fused, n_layer)
        outs.append(hc)
    ref_seq = jnp.stack(outs)
    assert jnp.allclose(h_seq, ref_seq, atol=1e-5, rtol=1e-5), \
        "sequence kernel mismatch vs iterated single-step kernel"

    print("KERNEL_OK")
</pallas_src>

<mosaic_0001>
module attributes {stable_mosaic.version = 11 : i64} {
  func.func @kernel(%arg0: i32, %arg1: memref<8x32xf32, #tpu.memory_space<vmem>>, %arg2: memref<8x32xf32, #tpu.memory_space<vmem>>, %arg3: memref<32x192xbf16, #tpu.memory_space<vmem>>, %arg4: memref<32x192xbf16, #tpu.memory_space<vmem>>, %arg5: memref<1x192xf32, #tpu.memory_space<vmem>>, %arg6: memref<1x192x192xbf16, #tpu.memory_space<vmem>>, %arg7: memref<1x1x192xf32, #tpu.memory_space<vmem>>, %arg8: memref<192x128xbf16, #tpu.memory_space<vmem>>, %arg9: memref<1x128xf32, #tpu.memory_space<vmem>>, %arg10: memref<8x32xf32, #tpu.memory_space<vmem>>) attributes {dimension_semantics = [#tpu.dimension_semantics<parallel>], iteration_bounds = array<i64: 1>, scalar_prefetch = 0 : i64, scratch_operands = 0 : i64, tpu.core_type = #tpu.core_type<tc>, window_params = [{transform_indices = @transform_0, window_bounds = array<i64: 8, 32>}, {transform_indices = @transform_1, window_bounds = array<i64: 8, 32>}, {pipeline_mode = #tpu.pipeline_mode<synchronous>, transform_indices = @transform_2, window_bounds = array<i64: 32, 192>}, {pipeline_mode = #tpu.pipeline_mode<synchronous>, transform_indices = @transform_3, window_bounds = array<i64: 32, 192>}, {pipeline_mode = #tpu.pipeline_mode<synchronous>, transform_indices = @transform_4, window_bounds = array<i64: 1, 192>}, {pipeline_mode = #tpu.pipeline_mode<synchronous>, transform_indices = @transform_5, window_bounds = array<i64: 1, 192, 192>}, {pipeline_mode = #tpu.pipeline_mode<synchronous>, transform_indices = @transform_6, window_bounds = array<i64: 1, 1, 192>}, {pipeline_mode = #tpu.pipeline_mode<synchronous>, transform_indices = @transform_7, window_bounds = array<i64: 192, 128>}, {pipeline_mode = #tpu.pipeline_mode<synchronous>, transform_indices = @transform_8, window_bounds = array<i64: 1, 128>}, {transform_indices = @transform_9, window_bounds = array<i64: 8, 32>}]} {
    %c0 = arith.constant 0 : index
    %c0_0 = arith.constant 0 : index
    %0 = vector.load %arg2[%c0, %c0_0] : memref<8x32xf32, #tpu.memory_space<vmem>>, vector<8x32xf32>
    %c0_1 = arith.constant 0 : index
    %c0_2 = arith.constant 0 : index
    %1 = vector.load %arg1[%c0_1, %c0_2] : memref<8x32xf32, #tpu.memory_space<vmem>>, vector<8x32xf32>
    %2 = arith.truncf %1 : vector<8x32xf32> to vector<8x32xbf16>
    %c0_3 = arith.constant 0 : index
    %c0_4 = arith.constant 0 : index
    %3 = vector.load %arg3[%c0_3, %c0_4] : memref<32x192xbf16, #tpu.memory_space<vmem>>, vector<32x192xbf16>
    %cst = arith.constant dense<0.000000e+00> : vector<8x192xf32>
    %4 = tpu.matmul %2, %3, %cst {dimension_numbers = #tpu.dot_dimension_numbers<[1], [0], [0], [1], [0, 0, 1, 1], [], []>} : vector<8x32xbf16>, vector<32x192xbf16>, vector<8x192xf32> -> vector<8x192xf32>
    %5 = arith.truncf %0 : vector<8x32xf32> to vector<8x32xbf16>
    %c0_5 = arith.constant 0 : index
    %c0_6 = arith.constant 0 : index
    %6 = vector.load %arg4[%c0_5, %c0_6] : memref<32x192xbf16, #tpu.memory_space<vmem>>, vector<32x192xbf16>
    %cst_7 = arith.constant dense<0.000000e+00> : vector<8x192xf32>
    %7 = tpu.matmul %5, %6, %cst_7 {dimension_numbers = #tpu.dot_dimension_numbers<[1], [0], [0], [1], [0, 0, 1, 1], [], []>} : vector<8x32xbf16>, vector<32x192xbf16>, vector<8x192xf32> -> vector<8x192xf32>
    %8 = arith.addf %4, %7 : vector<8x192xf32>
    %c0_8 = arith.constant 0 : index
    %c0_9 = arith.constant 0 : index
    %9 = vector.load %arg5[%c0_8, %c0_9] : memref<1x192xf32, #tpu.memory_space<vmem>>, vector<1x192xf32>
    %10 = vector.broadcast %9 : vector<1x192xf32> to vector<8x192xf32>
    %11 = arith.addf %8, %10 : vector<8x192xf32>
    %cst_10 = arith.constant 0.000000e+00 : f32
    %12 = vector.broadcast %cst_10 : f32 to vector<8x192xf32>
    %13 = arith.maximumf %11, %12 : vector<8x192xf32>
    %14 = arith.truncf %13 : vector<8x192xf32> to vector<8x192xbf16>
    %c0_11 = arith.constant 0 : index
    %c0_12 = arith.constant 0 : index
    %c0_13 = arith.constant 0 : index
    %15 = vector.load %arg6[%c0_11, %c0_12, %c0_13] : memref<1x192x192xbf16, #tpu.memory_space<vmem>>, vector<1x192x192xbf16>
    %16 = vector.shape_cast %15 : vector<1x192x192xbf16> to vector<192x192xbf16>
    %cst_14 = arith.constant dense<0.000000e+00> : vector<8x192xf32>
    %17 = tpu.matmul %14, %16, %cst_14 {dimension_numbers = #tpu.dot_dimension_numbers<[1], [0], [0], [1], [0, 0, 1, 1], [], []>} : vector<8x192xbf16>, vector<192x192xbf16>, vector<8x192xf32> -> vector<8x192xf32>
    %c0_15 = arith.constant 0 : index
    %c0_16 = arith.constant 0 : index
    %c0_17 = arith.constant 0 : index
    %18 = vector.load %arg7[%c0_15, %c0_16, %c0_17] : memref<1x1x192xf32, #tpu.memory_space<vmem>>, vector<1x1x192xf32>
    %19 = vector.shape_cast %18 : vector<1x1x192xf32> to vector<1x192xf32>
    %20 = vector.broadcast %19 : vector<1x192xf32> to vector<8x192xf32>
    %21 = arith.addf %17, %20 : vector<8x192xf32>
    %cst_18 = arith.constant 0.000000e+00 : f32
    %22 = vector.broadcast %cst_18 : f32 to vector<8x192xf32>
    %23 = arith.maximumf %21, %22 : vector<8x192xf32>
    %24 = arith.truncf %23 : vector<8x192xf32> to vector<8x192xbf16>
    %c0_19 = arith.constant 0 : index
    %c0_20 = arith.constant 0 : index
    %25 = vector.load %arg8[%c0_19, %c0_20] : memref<192x128xbf16, #tpu.memory_space<vmem>>, vector<192x128xbf16>
    %cst_21 = arith.constant dense<0.000000e+00> : vector<8x128xf32>
    %26 = tpu.matmul %24, %25, %cst_21 {dimension_numbers = #tpu.dot_dimension_numbers<[1], [0], [0], [1], [0, 0, 1, 1], [], []>} : vector<8x192xbf16>, vector<192x128xbf16>, vector<8x128xf32> -> vector<8x128xf32>
    %c0_22 = arith.constant 0 : index
    %c0_23 = arith.constant 0 : index
    %27 = vector.load %arg9[%c0_22, %c0_23] : memref<1x128xf32, #tpu.memory_space<vmem>>, vector<1x128xf32>
    %28 = vector.broadcast %27 : vector<1x128xf32> to vector<8x128xf32>
    %29 = arith.addf %26, %28 : vector<8x128xf32>
    %30 = vector.extract_strided_slice %29 {offsets = [0, 0], sizes = [8, 32], strides = [1, 1]} : vector<8x128xf32> to vector<8x32xf32>
    %31 = arith.negf %30 : vector<8x32xf32>
    %32 = math.exp %31 : vector<8x32xf32>
    %cst_24 = arith.constant 1.000000e+00 : f32
    %33 = vector.broadcast %cst_24 : f32 to vector<8x32xf32>
    %34 = arith.addf %33, %32 : vector<8x32xf32>
    %35 = arith.divf %33, %34 : vector<8x32xf32>
    %36 = vector.extract_strided_slice %29 {offsets = [0, 32], sizes = [8, 32], strides = [1, 1]} : vector<8x128xf32> to vector<8x32xf32>
    %37 = arith.negf %36 : vector<8x32xf32>
    %38 = math.exp %37 : vector<8x32xf32>
    %cst_25 = arith.constant 1.000000e+00 : f32
    %39 = vector.broadcast %cst_25 : f32 to vector<8x32xf32>
    %40 = arith.addf %39, %38 : vector<8x32xf32>
    %41 = arith.divf %39, %40 : vector<8x32xf32>
    %42 = vector.extract_strided_slice %29 {offsets = [0, 64], sizes = [8, 32], strides = [1, 1]} : vector<8x128xf32> to vector<8x32xf32>
    %43 = vector.extract_strided_slice %29 {offsets = [0, 96], sizes = [8, 32], strides = [1, 1]} : vector<8x128xf32> to vector<8x32xf32>
    %44 = arith.mulf %43, %35 : vector<8x32xf32>
    %45 = arith.addf %42, %44 : vector<8x32xf32>
    %46 = math.tanh %45 : vector<8x32xf32>
    %cst_26 = arith.constant 1.000000e+00 : f32
    %47 = vector.broadcast %cst_26 : f32 to vector<8x32xf32>
    %48 = arith.subf %47, %41 : vector<8x32xf32>
    %49 = arith.mulf %48, %46 : vector<8x32xf32>
    %50 = arith.mulf %41, %0 : vector<8x32xf32>
    %51 = arith.addf %49, %50 : vector<8x32xf32>
    %c0_27 = arith.constant 0 : index
    %c0_28 = arith.constant 0 : index
    %52 = vector.load %arg10[%c0_27, %c0_28] : memref<8x32xf32, #tpu.memory_space<vmem>>, vector<8x32xf32>
    tpu.vector_store %arg10[%c0_27, %c0_28], %51 {strides = array<i32>} : memref<8x32xf32, #tpu.memory_space<vmem>>, vector<8x32xf32>,
    return
  }
  func.func @transform_0(%arg0: i32) -> (i32, i32) {
    %c0_i32 = arith.constant 0 : i32
    %c0_i32_0 = arith.constant 0 : i32
    return %arg0, %c0_i32 : i32, i32
  }
  func.func @transform_1(%arg0: i32) -> (i32, i32) {
    %c0_i32 = arith.constant 0 : i32
    %c0_i32_0 = arith.constant 0 : i32
    return %arg0, %c0_i32 : i32, i32
  }
  func.func @transform_2(%arg0: i32) -> (i32, i32) {
    %c0_i32 = arith.constant 0 : i32
    %c0_i32_0 = arith.constant 0 : i32
    %c0_i32_1 = arith.constant 0 : i32
    return %c0_i32, %c0_i32_0 : i32, i32
  }
  func.func @transform_3(%arg0: i32) -> (i32, i32) {
    %c0_i32 = arith.constant 0 : i32
    %c0_i32_0 = arith.constant 0 : i32
    %c0_i32_1 = arith.constant 0 : i32
    return %c0_i32, %c0_i32_0 : i32, i32
  }
  func.func @transform_4(%arg0: i32) -> (i32, i32) {
    %c0_i32 = arith.constant 0 : i32
    %c0_i32_0 = arith.constant 0 : i32
    %c0_i32_1 = arith.constant 0 : i32
    return %c0_i32, %c0_i32_0 : i32, i32
  }
  func.func @transform_5(%arg0: i32) -> (i32, i32, i32) {
    %c0_i32 = arith.constant 0 : i32
    %c0_i32_0 = arith.constant 0 : i32
    %c0_i32_1 = arith.constant 0 : i32
    %c0_i32_2 = arith.constant 0 : i32
    return %c0_i32, %c0_i32_0, %c0_i32_1 : i32, i32, i32
  }
  func.func @transform_6(%arg0: i32) -> (i32, i32, i32) {
    %c0_i32 = arith.constant 0 : i32
    %c0_i32_0 = arith.constant 0 : i32
    %c0_i32_1 = arith.constant 0 : i32
    %c0_i32_2 = arith.constant 0 : i32
    return %c0_i32, %c0_i32_0, %c0_i32_1 : i32, i32, i32
  }
  func.func @transform_7(%arg0: i32) -> (i32, i32) {
    %c0_i32 = arith.constant 0 : i32
    %c0_i32_0 = arith.constant 0 : i32
    %c0_i32_1 = arith.constant 0 : i32
    return %c0_i32, %c0_i32_0 : i32, i32
  }
  func.func @transform_8(%arg0: i32) -> (i32, i32) {
    %c0_i32 = arith.constant 0 : i32
    %c0_i32_0 = arith.constant 0 : i32
    %c0_i32_1 = arith.constant 0 : i32
    return %c0_i32, %c0_i32_0 : i32, i32
  }
  func.func @transform_9(%arg0: i32) -> (i32, i32) {
    %c0_i32 = arith.constant 0 : i32
    %c0_i32_0 = arith.constant 0 : i32
    return %arg0, %c0_i32 : i32, i32
  }
}

</mosaic_0001>

<bundles_post_ra>
// kernel: tpu_custom_call.1
= control target key start
LH: loop header
LB: loop body
LE: loop exit
PB: predicated region body
PF: predicated region fallthrough
CT: control target
= control target key end

     0   :  { %14 = vsyncpa [#allocation3], 0  ;;  %s1158_s0 = inlined_call_operand.hbm [shape: f32[8,32], index: 0, kind: input, shape index: {}]   ;;  %s1159_s1 = inlined_call_operand.hbm [shape: f32[8,32], index: 1, kind: input, shape index: {}]   ;;  %s1160_s2 = inlined_call_operand.hbm [shape: bf16[32,192], index: 2, kind: input, shape index: {}]   ;;  %s1161_s3 = inlined_call_operand.hbm [shape: bf16[32,192], index: 3, kind: input, shape index: {}]   ;;  %s1162_s4 = inlined_call_operand.vmem [shape: f32[1,192], index: 4, kind: input, shape index: {}]   ;;  %s1163_s5 = inlined_call_operand.hbm [shape: bf16[1,192,192], index: 5, kind: input, shape index: {}]   ;;  %s1164_s6 = inlined_call_operand.vmem [shape: f32[1,1,192], index: 6, kind: input, shape index: {}]   ;;  %s1165_s7 = inlined_call_operand.hbm [shape: bf16[192,128], index: 7, kind: input, shape index: {}]   ;;  %s1166_s8 = inlined_call_operand.vmem [shape: f32[1,128], index: 8, kind: input, shape index: {}]   ;;  %s1167_s9 = inlined_call_operand.hbm [shape: f32[8,32], index: 9, kind: output, shape index: {}]  }
   0x1   :  { %15 = vsyncpa [#allocation6], 0 }
   0x2   :  { %16 = vsyncpa [#allocation9], 0 }
   0x3   :  { %17 = vsyncpa [#allocation12], 0 }
   0x4   :  { %18 = vsyncpa [#allocation4], 0  ;;  %s968_s30 = smov [#allocation5]   ;;  %s804_s13 = scalar_lea.hbm %s1159_s1, 128 }
   0x5   :  { %s35_s10 = sshll.u32 %s968_s30, 4  ;;  %p805_p0 = scmp.ne.s32.totalorder %s1159_s1, %s804_s13  ;;  %s36_s10 = int_to_ptr.vmem [resolvable:$true] %s35_s10 }
   0x6   :  { %p808_p1 = scmp.lt.u32.totalorder %s804_s13, %s1159_s1 }
   0x8   :  { %p810_p2 = pnand %p808_p1, %p805_p0 }
   0xa   :  { %813 = shalt.err (!%p810_p2)
}
   0xb   :  { %s814_s18 = scalar_lea.vmem %s36_s10, 128  ;;  %p819_p4 = scmp.lt.s32.totalorder %s36_s10, %s36_s10 }
   0xc   :  { %p815_p3 = scmp.ne.s32.totalorder %s36_s10, %s814_s18  ;;  %p820_p5 = scmp.lt.s32.totalorder %s814_s18, %s814_s18 }
   0xe   :  { %p821_p6 = por %p820_p5, %p819_p4 }
  0x10   :  { %p822_p7 = pnand %p821_p6, %p815_p3 }
  0x12   :  { %825 = shalt.err (!%p822_p7)
}
  0x13   :  { %38 = dma.hbm_to_vmem [thread:$0]  %s1159_s1, 128, %s36_s10, [#allocation6]  }
  0x14   :  { %s969_s21 = smov [#allocation8]   ;;  %s970_s23 = smov [#allocation2]  }
  0x15   :  { %s56_s22 = sshll.u32 %s969_s21, 4  ;;  %s25_s24 = sshll.u32 %s970_s23, 4  ;;  %s57_s22 = int_to_ptr.vmem [resolvable:$true] %s56_s22  ;;  %s26_s24 = int_to_ptr.vmem [resolvable:$true] %s25_s24 }
  0x16   :  { %s826_s27 = scalar_lea.hbm %s1161_s3, 512 }
  0x17   :  { %p827_p8 = scmp.ne.s32.totalorder %s1161_s3, %s826_s27  ;;  %p830_p9 = scmp.lt.u32.totalorder %s826_s27, %s1161_s3 }
  0x19   :  { %p832_p10 = pnand %p830_p9, %p827_p8 }
  0x1b   :  { %835 = shalt.err (!%p832_p10)
}
  0x1c   :  { %s836_s1 = scalar_lea.vmem %s57_s22, 512  ;;  %p841_p12 = scmp.lt.s32.totalorder %s57_s22, %s57_s22 }
  0x1d   :  { %p837_p11 = scmp.ne.s32.totalorder %s57_s22, %s836_s1  ;;  %p842_p13 = scmp.lt.s32.totalorder %s836_s1, %s836_s1 }
  0x1f   :  { %p843_p0 = por %p842_p13, %p841_p12 }
  0x21   :  { %p844_p1 = pnand %p843_p0, %p837_p11 }
  0x23   :  { %847 = shalt.err (!%p844_p1)
}
  0x24   :  { %s971_s10 = smov 128   ;;  %s972_s12 = smov 8  }
  0x25   :  { %62 = dma.hbm_to_vmem [thread:$0]  %s1161_s3, 512, %s57_s22, [#allocation9], %s971_s10, %s971_s10, %s972_s12  }
  0x26   :  { %s848_s17 = scalar_lea.hbm %s1158_s0, 128 }
  0x27   :  { %p849_p2 = scmp.ne.s32.totalorder %s1158_s0, %s848_s17  ;;  %p852_p3 = scmp.lt.u32.totalorder %s848_s17, %s1158_s0 }
  0x29   :  { %p854_p4 = pnand %p852_p3, %p849_p2 }
  0x2b   :  { %857 = shalt.err (!%p854_p4)
}
  0x2c   :  { %s858_s23 = scalar_lea.vmem %s26_s24, 128  ;;  %p863_p6 = scmp.lt.s32.totalorder %s26_s24, %s26_s24 }
  0x2d   :  { %p859_p5 = scmp.ne.s32.totalorder %s26_s24, %s858_s23  ;;  %p864_p7 = scmp.lt.s32.totalorder %s858_s23, %s858_s23 }
  0x2f   :  { %p865_p8 = por %p864_p7, %p863_p6 }
  0x31   :  { %p866_p9 = pnand %p865_p8, %p859_p5 }
  0x33   :  { %869 = shalt.err (!%p866_p9)
}
  0x34   :  { %28 = dma.hbm_to_vmem [thread:$0]  %s1158_s0, 128, %s26_s24, [#allocation3]  }
  0x35   :  { %s973_s25 = smov [#allocation7]   ;;  %s974_s27 = smov [#allocation10]  }
  0x36   :  { %s44_s26 = sshll.u32 %s973_s25, 4  ;;  %s70_s28 = sshll.u32 %s974_s27, 4  ;;  %s45_s26 = int_to_ptr.vmem [resolvable:$true] %s44_s26  ;;  %s71_s28 = int_to_ptr.vmem [resolvable:$true] %s70_s28 }
  0x37   :  { %s870_s11 = scalar_lea.hbm %s1160_s2, 512 }
  0x38   :  { %p871_p10 = scmp.ne.s32.totalorder %s1160_s2, %s870_s11  ;;  %p874_p11 = scmp.lt.u32.totalorder %s870_s11, %s1160_s2 }
  0x3a   :  { %p876_p12 = pnand %p874_p11, %p871_p10 }
  0x3c   :  { %879 = shalt.err (!%p876_p12)
}
  0x3d   :  { %s880_s0 = scalar_lea.vmem %s45_s26, 512  ;;  %p885_p0 = scmp.lt.s32.totalorder %s45_s26, %s45_s26 }
  0x3e   :  { %p881_p13 = scmp.ne.s32.totalorder %s45_s26, %s880_s0  ;;  %p886_p1 = scmp.lt.s32.totalorder %s880_s0, %s880_s0 }
  0x40   :  { %p887_p2 = por %p886_p1, %p885_p0 }
  0x42   :  { %p888_p3 = pnand %p887_p2, %p881_p13 }
  0x44   :  { %891 = shalt.err (!%p888_p3)
}
  0x45   :  { %50 = dma.hbm_to_vmem [thread:$0]  %s1160_s2, 512, %s45_s26, [#allocation6], %s971_s10, %s971_s10, %s972_s12  }
  0x46   :  { %s892_s19 = scalar_lea.hbm %s1163_s5, 3072 }
  0x47   :  { %p893_p4 = scmp.ne.s32.totalorder %s1163_s5, %s892_s19  ;;  %p896_p5 = scmp.lt.u32.totalorder %s892_s19, %s1163_s5 }
  0x49   :  { %p898_p6 = pnand %p896_p5, %p893_p4 }
  0x4b   :  { %901 = shalt.err (!%p898_p6)
}
  0x4c   :  { %s902_s22 = scalar_lea.vmem %s71_s28, 3072  ;;  %p907_p8 = scmp.lt.s32.totalorder %s71_s28, %s71_s28 }
  0x4d   :  { %p903_p7 = scmp.ne.s32.totalorder %s71_s28, %s902_s22  ;;  %p908_p9 = scmp.lt.s32.totalorder %s902_s22, %s902_s22 }
  0x4f   :  { %p909_p10 = por %p908_p9, %p907_p8 }
  0x51   :  { %p910_p11 = pnand %p909_p10, %p903_p7 }
  0x53   :  { %913 = shalt.err (!%p910_p11)
}
  0x54   :  { %76 = dma.hbm_to_vmem [thread:$0]  %s1163_s5, 3072, %s71_s28, [#allocation9], %s971_s10, %s971_s10, %s972_s12  }
  0x55   :  { %s975_s26 = smov [#allocation11]   ;;  %s914_s11 = scalar_lea.hbm %s1165_s7, 1536 }
  0x56   :  { %s84_s27 = sshll.u32 %s975_s26, 4  ;;  %p915_p12 = scmp.ne.s32.totalorder %s1165_s7, %s914_s11  ;;  %s85_s27 = int_to_ptr.vmem [resolvable:$true] %s84_s27 }
  0x57   :  { %p918_p13 = scmp.lt.u32.totalorder %s914_s11, %s1165_s7 }
  0x59   :  { %p920_p0 = pnand %p918_p13, %p915_p12 }
  0x5b   :  { %923 = shalt.err (!%p920_p0)
}
  0x5c   :  { %s924_s0 = scalar_lea.vmem %s85_s27, 1536  ;;  %p929_p2 = scmp.lt.s32.totalorder %s85_s27, %s85_s27 }
  0x5d   :  { %p925_p1 = scmp.ne.s32.totalorder %s85_s27, %s924_s0  ;;  %p930_p3 = scmp.lt.s32.totalorder %s924_s0, %s924_s0 }
  0x5f   :  { %p931_p4 = por %p930_p3, %p929_p2 }
  0x61   :  { %p932_p5 = pnand %p931_p4, %p925_p1 }
  0x63   :  { %935 = shalt.err (!%p932_p5)
}
  0x64   :  { %s976_s5 = smov 64   ;;  %s977_s10 = smov 4  }
  0x65   :  { %90 = dma.hbm_to_vmem [thread:$0]  %s1165_s7, 1536, %s85_s27, [#allocation12], %s976_s5, %s976_s5, %s977_s10  }
  0x66   :  { %958 = dma.done.wait [#allocation3], 128  }
  0x67   :  { %959 = vsyncadd [#allocation3], 4294967168 }
  0x68   :  { %960 = dma.done.wait [#allocation6], 640  }
  0x69   :  { %961 = vsyncadd [#allocation6], 4294966656 }
  0x6a   :  { %962 = dma.done.wait [#allocation9], 3584  }
  0x6b   :  { %963 = vsyncadd [#allocation9], 4294963712 }
  0x6c   :  { %964 = dma.done.wait [#allocation12], 1536  }
  0x6d   :  { %965 = vsyncadd [#allocation12], 4294965760  ;;  %v978_v0 = vmov 0   ;;  %v738_v1 = vld [vmem:[#allocation8 + $0x4] ss:$8 sps:$4 sm:$0xff]   ;;  %v1115_v9 = vld [vmem:[#allocation5] sm:$0xff]  ;;  %v255_v47 = vlaneseq }
  0x6e   :  { %180 = vmatprep.mubr.bf16.mxu0 %v978_v0  ;;  %244 = vmatprep.mubr.bf16.mxu1 %v978_v0  ;;  %v740_v2 = vld [vmem:[#allocation7 + $0x4] ss:$8 sps:$4 sm:$0xff]   ;;  %v742_v3 = vld [vmem:[#allocation8] ss:$8 sps:$4 sm:$0xff]   ;;  %v744_v5 = vld [vmem:[#allocation8 + $0x14] ss:$8 sps:$4 sm:$0xff]   ;;  %v119_v11 = vpack.c.bf16 %v1115_v9, %v1115_v9 }
  0x6f   :  { %148 = vmatprep.subr.bf16.mxu0 %v738_v1  ;;  %v743_v4 = vld [vmem:[#allocation7] ss:$8 sps:$4 sm:$0xff]   ;;  %212 = vmatprep.subr.bf16.mxu1 %v740_v2  ;;  %v746_v6 = vld [vmem:[#allocation7 + $0x14] ss:$8 sps:$4 sm:$0xff]   ;;  %v748_v7 = vld [vmem:[#allocation8 + $0x10] ss:$8 sps:$4 sm:$0xff]  }
  0x70   :  { %149 = vmatpush1.bf16.msra.mxu0 %v742_v3  ;;  %213 = vmatpush1.bf16.msra.mxu1 %v743_v4  ;;  %v749_v8 = vld [vmem:[#allocation7 + $0x10] ss:$8 sps:$4 sm:$0xff]   ;;  %v752_v13 = vld [vmem:[#allocation10 + $0x4] ss:$8 sps:$4 sm:$0xff]   ;;  %vm144_vm0 = vcmask 261120   ;;  %v256_v48 = vshrl.u32 %v255_v47, 7 }
  0x71   :  { %150 = vmatprep.subr.bf16.mxu0 %v744_v5  ;;  %v113_v10 = vld [vmem:[#allocation2] sm:$0xff]  ;;  %214 = vmatprep.subr.bf16.mxu1 %v746_v6  ;;  %v750_v14 = vld [vmem:[#allocation10] ss:$8 sps:$4 sm:$0xff]   ;;  %v758_v17 = vld [vmem:[#allocation10 + $0x24] ss:$8 sps:$4 sm:$0xff]   ;;  %vm427_vm1 = vcmask 523264  }
  0x72   :  { %v114_v12 = vpack.c.bf16 %v113_v10, %v113_v10  ;;  %v755_v15 = vld [vmem:[#allocation10 + $0x14] ss:$8 sps:$4 sm:$0xff]   ;;  %v753_v16 = vld [vmem:[#allocation10 + $0x10] ss:$8 sps:$4 sm:$0xff]   ;;  %v756_v18 = vld [vmem:[#allocation10 + $0x20] ss:$8 sps:$4 sm:$0xff]  }
  0x73   :  { %v761_v19 = vld [vmem:[#allocation10 + $0x34] ss:$8 sps:$4 sm:$0xff]   ;;  %v759_v20 = vld [vmem:[#allocation10 + $0x30] ss:$8 sps:$4 sm:$0xff]   ;;  %v764_v21 = vld [vmem:[#allocation10 + $0x44] ss:$8 sps:$4 sm:$0xff]  }
  0x74   :  { %151 = vmatpush1.bf16.msra.mxu0 %v748_v7  ;;  %215 = vmatpush1.bf16.msra.mxu1 %v749_v8  ;;  %v762_v22 = vld [vmem:[#allocation10 + $0x40] ss:$8 sps:$4 sm:$0xff]   ;;  %v767_v23 = vld [vmem:[#allocation10 + $0x54] ss:$8 sps:$4 sm:$0xff]   ;;  %v765_v24 = vld [vmem:[#allocation10 + $0x50] ss:$8 sps:$4 sm:$0xff]  }
  0x75   :  { %431 = vmatprep.subr.bf16.mxu0 %v752_v13  ;;  %582 = vmatprep.subr.bf16.mxu1 %v978_v0  ;;  %v770_v25 = vld [vmem:[#allocation10 + $0x64] ss:$8 sps:$4 sm:$0xff]   ;;  %v768_v26 = vld [vmem:[#allocation10 + $0x60] ss:$8 sps:$4 sm:$0xff]   ;;  %v773_v27 = vld [vmem:[#allocation10 + $0x74] ss:$8 sps:$4 sm:$0xff]  }
  0x76   :  { %v771_v28 = vld [vmem:[#allocation10 + $0x70] ss:$8 sps:$4 sm:$0xff]   ;;  %v776_v29 = vld [vmem:[#allocation10 + $0x84] ss:$8 sps:$4 sm:$0xff]   ;;  %v774_v30 = vld [vmem:[#allocation10 + $0x80] ss:$8 sps:$4 sm:$0xff]  }
  0x77   :  { %678 = vmatmul.mubr.msk.bf16.vlgmr.msra.gmra.mrb[0].mxu0 %vm144_vm0, %v119_v11  ;;  %683 = vmatmul.mubr.msk.bf16.vlgmr.msra.gmra.mrb[0].mxu1 %vm144_vm0, %v114_v12  ;;  %v779_v31 = vld [vmem:[#allocation10 + $0x94] ss:$8 sps:$4 sm:$0xff]   ;;  %v777_v32 = vld [vmem:[#allocation10 + $0x90] ss:$8 sps:$4 sm:$0xff]   ;;  %v782_v33 = vld [vmem:[#allocation10 + $0xa4] ss:$8 sps:$4 sm:$0xff]  }
  0x78   :  { %432 = vmatpush1.bf16.msra.mxu0 %v750_v14  ;;  %v780_v34 = vld [vmem:[#allocation10 + $0xa0] ss:$8 sps:$4 sm:$0xff]   ;;  %v785_v35 = vld [vmem:[#allocation10 + $0xb4] ss:$8 sps:$4 sm:$0xff]   ;;  %v783_v36 = vld [vmem:[#allocation10 + $0xb0] ss:$8 sps:$4 sm:$0xff]  }
  0x79   :  { %433 = vmatprep.subr.bf16.mxu0 %v755_v15  ;;  %v786_v37 = vld [vmem:[#allocation11] sm:$0xff]   ;;  %v787_v38 = vld [vmem:[#allocation11 + $0x8] sm:$0xff]   ;;  %v788_v39 = vld [vmem:[#allocation11 + $0x10] sm:$0xff]   ;;  %v257_v49 = vsub.s32 0, %v256_v48  ;;  %v261_v51 = vsub.s32 1, %v256_v48  ;;  %s981_s19 = smov [#allocation13]  }
  0x7a   :  { %583 = vmatpush1.bf16.msra.mxu1 %v786_v37  ;;  %v789_v40 = vld [vmem:[#allocation11 + $0x18] sm:$0xff]   ;;  %v790_v41 = vld [vmem:[#allocation11 + $0x20] sm:$0xff]   ;;  %v791_v42 = vld [vmem:[#allocation11 + $0x28] sm:$0xff]   ;;  %s662_s20 = sshll.u32 %s981_s19, 4  ;;  %s663_s20 = int_to_ptr.vmem [resolvable:$true] %s662_s20 }
  0x7b   :  { %584 = vmatprep.subr.bf16.mxu1 %v978_v0  ;;  %v792_v43 = vld [vmem:[#allocation11 + $0x30] sm:$0xff]   ;;  %v793_v44 = vld [vmem:[#allocation11 + $0x38] sm:$0xff]   ;;  %v794_v45 = vld [vmem:[#allocation11 + $0x40] sm:$0xff]   ;;  %s936_s21 = scalar_lea.vmem %s663_s20, 128  ;;  %p941_p7 = scmp.lt.s32.totalorder %s663_s20, %s663_s20 }
  0x7c   :  { %434 = vmatpush1.bf16.msra.mxu0 %v753_v16  ;;  %v795_v46 = vld [vmem:[#allocation11 + $0x48] sm:$0xff]   ;;  %v253_v50 = vld [vmem:[%s1162_s4] sm:$0x3]  ;;  %v797_v8 = vld [vmem:[#allocation11 + $0x58] sm:$0xff]   ;;  %p937_p6 = scmp.ne.s32.totalorder %s663_s20, %s936_s21  ;;  %p942_p8 = scmp.lt.s32.totalorder %s936_s21, %s936_s21 }
  0x7d   :  { %435 = vmatprep.subr.bf16.mxu0 %v758_v17  ;;  %v258_v52 = vrot.slane %v253_v50, %v257_v49  ;;  %v262_v55 = vrot.slane %v253_v50, %v261_v51  ;;  %v796_v7 = vld [vmem:[#allocation11 + $0x50] sm:$0xff]  }
  0x7e   :  { %585 = vmatpush1.bf16.msra.mxu1 %v787_v38  ;;  %v295_v10 = vld [vmem:[%s1164_s6] sm:$0x3]  ;;  %s979_s6 = smov 96   ;;  %p943_p9 = por %p942_p8, %p941_p7 }
  0x7f   :  { %586 = vmatprep.subr.bf16.mxu1 %v978_v0  ;;  %v300_v11 = vrot.slane %v295_v10, %v257_v49  ;;  %v304_v12 = vrot.slane %v295_v10, %v261_v51 }
  0x80   :  { %436 = vmatpush1.bf16.msra.mxu0 %v756_v18  ;;  %p944_p10 = pnand %p943_p9, %p937_p6 }
  0x81   :  { %437 = vmatprep.subr.bf16.mxu0 %v761_v19 }
  0x82   :  { %587 = vmatpush1.bf16.msra.mxu1 %v788_v39 }
  0x83   :  { %588 = vmatprep.subr.bf16.mxu1 %v978_v0 }
  0x84   :  { %438 = vmatpush1.bf16.msra.mxu0 %v759_v20 }
  0x85   :  { %439 = vmatprep.subr.bf16.mxu0 %v764_v21 }
  0x86   :  { %589 = vmatpush1.bf16.msra.mxu1 %v789_v40 }
  0x87   :  { %590 = vmatprep.subr.bf16.mxu1 %v978_v0 }
  0x88   :  { %440 = vmatpush1.bf16.msra.mxu0 %v762_v22 }
  0x89   :  { %441 = vmatprep.subr.bf16.mxu0 %v767_v23 }
  0x8a   :  { %591 = vmatpush1.bf16.msra.mxu1 %v790_v41 }
  0x8b   :  { %592 = vmatprep.subr.bf16.mxu1 %v978_v0 }
  0x8c   :  { %442 = vmatpush1.bf16.msra.mxu0 %v765_v24 }
  0x8d   :  { %443 = vmatprep.subr.bf16.mxu0 %v770_v25 }
  0x8e   :  { %593 = vmatpush1.bf16.msra.mxu1 %v791_v42 }
  0x8f   :  { %594 = vmatprep.subr.bf16.mxu1 %v978_v0 }
  0x90   :  { %444 = vmatpush1.bf16.msra.mxu0 %v768_v26 }
  0x91   :  { %445 = vmatprep.subr.bf16.mxu0 %v773_v27 }
  0x92   :  { %595 = vmatpush1.bf16.msra.mxu1 %v792_v43 }
  0x93   :  { %596 = vmatprep.subr.bf16.mxu1 %v978_v0 }
  0x94   :  { %446 = vmatpush1.bf16.msra.mxu0 %v771_v28 }
  0x95   :  { %447 = vmatprep.subr.bf16.mxu0 %v776_v29 }
  0x96   :  { %597 = vmatpush1.bf16.msra.mxu1 %v793_v44 }
  0x97   :  { %598 = vmatprep.subr.bf16.mxu1 %v978_v0 }
  0x98   :  { %448 = vmatpush1.bf16.msra.mxu0 %v774_v30 }
  0x99   :  { %449 = vmatprep.subr.bf16.mxu0 %v779_v31 }
  0x9a   :  { %599 = vmatpush1.bf16.msra.mxu1 %v794_v45 }
  0x9b   :  { %600 = vmatprep.subr.bf16.mxu1 %v978_v0 }
  0x9c   :  { %450 = vmatpush1.bf16.msra.mxu0 %v777_v32 }
  0x9d   :  { %451 = vmatprep.subr.bf16.mxu0 %v782_v33 }
  0x9e   :  { %601 = vmatpush1.bf16.msra.mxu1 %v795_v46 }
  0x9f   :  { %602 = vmatprep.subr.bf16.mxu1 %v978_v0 }
  0xa0   :  { %452 = vmatpush1.bf16.msra.mxu0 %v780_v34 }
  0xa1   :  { %453 = vmatprep.subr.bf16.mxu0 %v785_v35 }
  0xa2   :  { %603 = vmatpush1.bf16.msra.mxu1 %v796_v7 }
  0xa3   :  { %604 = vmatprep.subr.bf16.mxu1 %v978_v0  ;;  %v709_v0 = vld [vmem:[%s1166_s8] ss:$0 sm:$0xff]  ;;  %s980_s8 = smov 32  }
  0xa4   :  { %454 = vmatpush1.bf16.msra.mxu0 %v783_v36 }
  0xa6   :  { %605 = vmatpush1.bf16.msra.mxu1 %v797_v8 }
 0x14a   :  { %v182_v53 = vpop.f32.mrb[0].mxu0  ;;  %v246_v54 = vpop.f32.mrb[0].mxu1 }
 0x14b   :  { %v247_v56 = vadd.f32 %v246_v54, %v182_v53  ;;  %v184_v57 = vpop.f32.mrb[1].mxu0  ;;  %v248_v58 = vpop.f32.mrb[1].mxu1 }
 0x14c   :  { %v249_v59 = vadd.f32 %v248_v58, %v184_v57  ;;  %v186_v60 = vpop.f32.mrb[2].mxu0  ;;  %v250_v61 = vpop.f32.mrb[2].mxu1 }
 0x14d   :  { %v265_v62 = vadd.f32 %v258_v52, %v247_v56  ;;  %v187_v63 = vpop.f32.mrb[3].mxu0  ;;  %v251_v1 = vpop.f32.mrb[3].mxu1 }
 0x14e   :  { %v266_v2 = vadd.f32 %v262_v55, %v249_v59 }
 0x14f   :  { %v267_v3 = vmax.f32 %v265_v62, 0.0 }
 0x150   :  { %v268_v4 = vmax.f32 %v266_v2, 0.0 }
 0x151   :  { %v269_v6 = vpack.c.bf16 %v267_v3, %v267_v3 }
 0x152   :  { %v270_v5 = vpack.c.bf16 %v268_v4, %v268_v4 }
 0x154   :  { %708 = vmatprep.mubr.msk.bf16.mxu0 %vm427_vm1, %v270_v5 }
 0x155   :  { %464 = vmatmul.mubr.bf16.vlgmr.msra.gmra.mrb[4].mxu0 %v269_v6 }
 0x228   :  { %v465_v13 = vpop.f32.mrb[4].mxu0 }
 0x229   :  { %v466_v14 = vadd.f32 %v465_v13, %v300_v11  ;;  %v467_v15 = vpop.f32.mrb[5].mxu0 }
 0x22a   :  { %v468_v16 = vadd.f32 %v467_v15, %v304_v12  ;;  %v469_v17 = vpop.f32.mrb[6].mxu0 }
 0x22b   :  { %v472_v18 = vmax.f32 %v466_v14, 0.0  ;;  %v470_v19 = vpop.f32.mrb[7].mxu0 }
 0x22c   :  { %v473_v20 = vmax.f32 %v468_v16, 0.0 }
 0x22d   :  { %v474_v22 = vpack.c.bf16 %v472_v18, %v472_v18 }
 0x22e   :  { %v475_v21 = vpack.c.bf16 %v473_v20, %v473_v20 }
 0x230   :  { %722 = vmatprep.mubr.msk.bf16.mxu1 %vm427_vm1, %v475_v21 }
 0x231   :  { %615 = vmatmul.mubr.bf16.vlgmr.msra.gmra.mrb[4].mxu1 %v474_v22 }
 0x304   :  { %v616_v23 = vpop.f32.mrb[4].mxu1 }
 0x305   :  { %v617_v24 = vadd.f32 %v709_v0, %v616_v23  ;;  %v618_v25 = vpop.f32.mrb[5].mxu1 }
 0x306   :  { %v619_v26 = vpop.f32.mrb[6].mxu1 }
 0x307   :  { %v723_v27 = vmul.f32 -1.442695, %v617_v24  ;;  %v620_v28 = vpop.f32.mrb[7].mxu1 }
 0x309   :  { %798 = vpow2.f32 %v723_v27 }
 0x313   :  { %v799_v29 = vpop.eup %798 }
 0x314   :  { %v625_v30 = vadd.f32 1.0, %v799_v29 }
 0x316   :  { %800 = vrcp.f32 %v625_v30 }
 0x320   :  { %v801_v31 = vpop.eup %800 }
 0x321   :  { %629 = vrot.lane.b32.xlu0 %v801_v31, %s979_s6  ;;  %v639_v38 = vsub.f32 1.0, %v801_v31 }
 0x393   :  { %v630_v32 = vpop.permute.xlu0 %629 }
 0x394   :  { %v632_v33 = vmul.f32 %v630_v32, %v617_v24 }
 0x396   :  { %634 = vrot.lane.b32.xlu0 %v632_v33, %s979_s6 }
 0x408   :  { %v635_v34 = vpop.permute.xlu0 %634 }
 0x409   :  { %v637_v35 = vadd.f32 %v635_v34, %v617_v24 }
 0x40b   :  { %802 = vtanh.f32 %v637_v35 }
 0x415   :  { %v803_v36 = vpop.eup %802 }
 0x416   :  { %641 = vrot.lane.b32.xlu1 %v803_v36, %s979_s6 }
 0x41a   :  { %646 = vrot.lane.b32.xlu1 %v1115_v9, %s980_s8 }
 0x488   :  { %v642_v37 = vpop.permute.xlu1 %641 }
 0x489   :  { %v644_v40 = vmul.f32 %v642_v37, %v639_v38 }
 0x48c   :  { %v647_v39 = vpop.permute.xlu1 %646 }
 0x48d   :  { %v649_v41 = vmul.f32 %v801_v31, %v647_v39 }
 0x48f   :  { %v650_v42 = vadd.f32 %v649_v41, %v644_v40 }
 0x491   :  { %652 = vrot.lane.b32.xlu0 %v650_v42, %s979_s6 }
 0x503   :  { %v653_v43 = vpop.permute.xlu0 %652 }
 0x504   :  { %655 = vst.msk [vmem:[#allocation13] sm:$0xff] %vm144_vm0, %v653_v43 }
 0x505   :  { %947 = shalt.err (!%p944_p10)
}
 0x506   :  { %s948_s22 = scalar_lea.hbm %s1167_s9, 128 }
 0x507   :  { %p949_p11 = scmp.ne.s32.totalorder %s1167_s9, %s948_s22  ;;  %p952_p12 = scmp.lt.u32.totalorder %s948_s22, %s1167_s9 }
 0x509   :  { %p954_p13 = pnand %p952_p12, %p949_p11 }
 0x50b   :  { %957 = shalt.err (!%p954_p13)
}
 0x50c   :  { %665 = dma.vmem_to_hbm [thread:$0]  %s663_s20, 128, %s1167_s9, [#allocation4]  }
 0x50d   :  { %966 = dma.done.wait [#allocation4], 128  }
 0x50e   :  { %967 = vsyncadd [#allocation4], 4294967168 }
 0x50f   :  { %669 = vsyncpa [#allocation3], 1 }
 0x510   :  { %670 = vsyncpa [#allocation6], 1 }
 0x511   :  { %671 = vsyncpa [#allocation9], 1 }
 0x512   :  { %672 = vsyncpa [#allocation12], 1 }
 0x513   :  { %673 = vsyncpa [#allocation4], 1 }

</bundles_post_ra>
